<compile_context>
chip_gen: v7x
topology: tpu7x:2x2x1
jax: 0.10.0
libtpu: 0.0.40
codegen_flags: <defaults>
</compile_context>

<pallas_src>
import functools

import jax
import jax.numpy as jnp
from jax.experimental import pallas as pl
from jax.experimental.pallas import tpu as pltpu


def _round_up(a, b):
    return (a + b - 1) // b * b


def _ffn_kernel(x_ref, w1_ref, b1_ref, w2_ref, b2_ref, gamma_ref, beta_ref,
                o_ref, *, eps, h_valid):
    """One row-tile of fused FFN + residual + LayerNorm (hidden padded to Hp lanes)."""
    hp = x_ref.shape[-1]
    x = x_ref[...].astype(jnp.float32)                       # (TM, Hp) residual path, f32

    # W_1(x) + b1 -> ReLU   (dropout == identity at inference)
    # Matmul operands in the weights' dtype (bf16 by default), f32 accumulation.
    h = jnp.dot(x.astype(w1_ref.dtype), w1_ref[...],
                preferred_element_type=jnp.float32)
    h = jnp.maximum(h + b1_ref[...], 0.0)

    # W_2(.) + b2, residual add in f32.
    y = jnp.dot(h.astype(w2_ref.dtype), w2_ref[...],
                preferred_element_type=jnp.float32)
    y = y + b2_ref[...] + x

    # LayerNorm over the true hidden width (padded lanes of y are exactly zero,
    # so the sum already only sees valid lanes; mask them for the variance).
    inv_h = 1.0 / float(h_valid)
    mean = jnp.sum(y, axis=-1, keepdims=True) * inv_h
    centered = y - mean
    if h_valid != hp:
        lane = jax.lax.broadcasted_iota(jnp.int32, y.shape, dimension=1)
        centered = jnp.where(lane < h_valid, centered, 0.0)
    var = jnp.sum(centered * centered, axis=-1, keepdims=True) * inv_h
    normed = centered * jax.lax.rsqrt(var + eps)

    o_ref[...] = (normed * gamma_ref[...] + beta_ref[...]).astype(o_ref.dtype)


def positionwise_feed_forward(x, w1, b1, w2, b2, gamma, beta, *,
                              eps=1e-6, row_tile=512,
                              weight_dtype=jnp.bfloat16, out_dtype=None):
    """x: [batch, seq, hidden]. w1/w2: PyTorch Linear weights [out, in]; b/gamma/beta: [hidden]."""
    B, S, H = x.shape
    M = B * S
    out_dtype = x.dtype if out_dtype is None else out_dtype

    # Lane-dense hidden dimension: pad to a multiple of 128.
    Hp = _round_up(H, 128)

    # Row tile: as large as requested (multiple of 8 sublanes), but keep the
    # grid at >= 2 steps so both v7x TensorCores get work on small problems.
    rt = max(8, min(_round_up(row_tile, 8), _round_up(pl.cdiv(M, 2), 8)))
    Mp = _round_up(M, rt)
    grid = (Mp // rt,)

    x2d = jnp.pad(x.reshape(M, H), ((0, Mp - M), (0, Hp - H)))

    def pad_w(w):  # torch Linear weight [out, in] -> padded, transposed [in_p, out_p]
        return jnp.pad(jnp.transpose(w), ((0, Hp - H), (0, Hp - H))).astype(weight_dtype)

    def pad_v(v):  # [H] -> [1, Hp] f32 (elementwise / LN path stays f32)
        return jnp.pad(v.reshape(1, H), ((0, 0), (0, Hp - H))).astype(jnp.float32)

    operands = (x2d, pad_w(w1), pad_v(b1), pad_w(w2), pad_v(b2),
                pad_v(gamma), pad_v(beta))

    # Raise the scoped VMEM limit above the 16/32 MiB default; size it from the
    # chip's capacity so the same code is valid on v5e/v6e (128 MiB) and v7x (64 MiB).
    try:
        vmem_cap = pltpu.get_tpu_info().vmem_capacity_bytes
    except Exception:
        vmem_cap = 64 * 1024 * 1024
    vmem_limit = int(min(vmem_cap * 3 // 4, 100 * 1024 * 1024))

    # TODO(synk): if hidden grows large enough that the full (Hp, Hp) weights no
    # longer fit VMEM (esp. v7x), add N/K "arbitrary" grid axes + an f32
    # accumulator scratch instead of full weight residency.

    def build(single_buffer_consts):
        ckw = {"pipeline_mode": pl.Buffered(1)} if single_buffer_consts else {}
        hh = pl.BlockSpec((Hp, Hp), lambda i: (0, 0), **ckw)   # grid-invariant weights
        vh = pl.BlockSpec((1, Hp), lambda i: (0, 0), **ckw)    # grid-invariant vectors
        return pl.pallas_call(
            functools.partial(_ffn_kernel, eps=eps, h_valid=H),
            out_shape=jax.ShapeDtypeStruct((Mp, Hp), out_dtype),
            grid_spec=pltpu.PrefetchScalarGridSpec(
                num_scalar_prefetch=0,
                grid=grid,
                in_specs=[
                    pl.BlockSpec((rt, Hp), lambda i: (i, 0)),  # x row tile
                    hh, vh,                                    # W1^T, b1
                    hh, vh,                                    # W2^T, b2
                    vh, vh,                                    # gamma, beta
                ],
                out_specs=pl.BlockSpec((rt, Hp), lambda i: (i, 0)),
            ),
            compiler_params=pltpu.CompilerParams(
                dimension_semantics=("parallel",),
                vmem_limit_bytes=vmem_limit),
        )

    try:
        out2d = build(True)(*operands)
    except Exception:
        # Single-buffering the constant operands is an optional optimization;
        # fall back to default buffering if this build rejects pl.Buffered(1).
        out2d = build(False)(*operands)

    return out2d[:M, :H].reshape(B, S, H)


def _reference(x, w1, b1, w2, b2, gamma, beta, eps=1e-6):
    # Pure-JAX f32 reference matching the PyTorch forward (dropout = identity).
    h = jnp.maximum(jnp.einsum('bsh,oh->bso', x, w1) + b1, 0.0)
    y = jnp.einsum('bsh,oh->bso', h, w2) + b2
    y = y + x
    mean = jnp.mean(y, axis=-1, keepdims=True)
    var = jnp.mean((y - mean) ** 2, axis=-1, keepdims=True)
    return (y - mean) * jax.lax.rsqrt(var + eps) * gamma + beta


if __name__ == "__main__":
    batch, seq, hidden = 2, 8, 32   # hidden_units = 32
    key = jax.random.PRNGKey(0)
    kx, k1, k2, k3, k4 = jax.random.split(key, 5)

    x = jax.random.normal(kx, (batch, seq, hidden), dtype=jnp.float32)

    # nn.Linear(hidden, hidden) weights: [out, in]; biases: [out]
    bound = 1.0 / jnp.sqrt(hidden)
    w1 = jax.random.uniform(k1, (hidden, hidden), jnp.float32, -bound, bound)
    b1 = jax.random.uniform(k2, (hidden,), jnp.float32, -bound, bound)
    w2 = jax.random.uniform(k3, (hidden, hidden), jnp.float32, -bound, bound)
    b2 = jax.random.uniform(k4, (hidden,), jnp.float32, -bound, bound)
    # nn.LayerNorm affine params: ones / zeros (default init)
    gamma = jnp.ones((hidden,), jnp.float32)
    beta = jnp.zeros((hidden,), jnp.float32)

    ref = _reference(x, w1, b1, w2, b2, gamma, beta)

    # Default (performance) path: bf16 MXU operands, f32 accumulation + f32 LN.
    out = positionwise_feed_forward(x, w1, b1, w2, b2, gamma, beta)
    out = jax.block_until_ready(out)
    assert out.shape == (batch, seq, hidden)
    assert jnp.allclose(out, ref, atol=2e-2, rtol=2e-2), "bf16 path mismatch"

    # Full-precision path (f32 weights) to validate the fused residual+LN math.
    out_f32 = positionwise_feed_forward(x, w1, b1, w2, b2, gamma, beta,
                                        weight_dtype=jnp.float32)
    out_f32 = jax.block_until_ready(out_f32)
    assert jnp.allclose(out_f32, ref, atol=1e-4, rtol=1e-4), "f32 path mismatch"

    print("KERNEL_OK")
</pallas_src>

<mosaic_0001>
module attributes {stable_mosaic.version = 11 : i64} {
  func.func @_ffn_kernel(%arg0: i32, %arg1: memref<8x128xf32, #tpu.memory_space<vmem>>, %arg2: memref<128x128xbf16, #tpu.memory_space<vmem>>, %arg3: memref<1x128xf32, #tpu.memory_space<vmem>>, %arg4: memref<128x128xbf16, #tpu.memory_space<vmem>>, %arg5: memref<1x128xf32, #tpu.memory_space<vmem>>, %arg6: memref<1x128xf32, #tpu.memory_space<vmem>>, %arg7: memref<1x128xf32, #tpu.memory_space<vmem>>, %arg8: memref<8x128xf32, #tpu.memory_space<vmem>>) attributes {dimension_semantics = [#tpu.dimension_semantics<parallel>], iteration_bounds = array<i64: 2>, scalar_prefetch = 0 : i64, scratch_operands = 0 : i64, tpu.core_type = #tpu.core_type<tc>, window_params = [{transform_indices = @transform_0, window_bounds = array<i64: 8, 128>}, {pipeline_mode = #tpu.pipeline_mode<synchronous>, transform_indices = @transform_1, window_bounds = array<i64: 128, 128>}, {pipeline_mode = #tpu.pipeline_mode<synchronous>, transform_indices = @transform_2, window_bounds = array<i64: 1, 128>}, {pipeline_mode = #tpu.pipeline_mode<synchronous>, transform_indices = @transform_3, window_bounds = array<i64: 128, 128>}, {pipeline_mode = #tpu.pipeline_mode<synchronous>, transform_indices = @transform_4, window_bounds = array<i64: 1, 128>}, {pipeline_mode = #tpu.pipeline_mode<synchronous>, transform_indices = @transform_5, window_bounds = array<i64: 1, 128>}, {pipeline_mode = #tpu.pipeline_mode<synchronous>, transform_indices = @transform_6, window_bounds = array<i64: 1, 128>}, {transform_indices = @transform_7, window_bounds = array<i64: 8, 128>}]} {
    %c0 = arith.constant 0 : index
    %c0_0 = arith.constant 0 : index
    %0 = vector.load %arg1[%c0, %c0_0] : memref<8x128xf32, #tpu.memory_space<vmem>>, vector<8x128xf32>
    %1 = arith.truncf %0 : vector<8x128xf32> to vector<8x128xbf16>
    %c0_1 = arith.constant 0 : index
    %c0_2 = arith.constant 0 : index
    %2 = vector.load %arg2[%c0_1, %c0_2] : memref<128x128xbf16, #tpu.memory_space<vmem>>, vector<128x128xbf16>
    %cst = arith.constant dense<0.000000e+00> : vector<8x128xf32>
    %3 = tpu.matmul %1, %2, %cst {dimension_numbers = #tpu.dot_dimension_numbers<[1], [0], [0], [1], [0, 0, 1, 1], [], []>} : vector<8x128xbf16>, vector<128x128xbf16>, vector<8x128xf32> -> vector<8x128xf32>
    %c0_3 = arith.constant 0 : index
    %c0_4 = arith.constant 0 : index
    %4 = vector.load %arg3[%c0_3, %c0_4] : memref<1x128xf32, #tpu.memory_space<vmem>>, vector<1x128xf32>
    %5 = vector.broadcast %4 : vector<1x128xf32> to vector<8x128xf32>
    %6 = arith.addf %3, %5 : vector<8x128xf32>
    %cst_5 = arith.constant 0.000000e+00 : f32
    %7 = vector.broadcast %cst_5 : f32 to vector<8x128xf32>
    %8 = arith.maximumf %6, %7 : vector<8x128xf32>
    %9 = arith.truncf %8 : vector<8x128xf32> to vector<8x128xbf16>
    %c0_6 = arith.constant 0 : index
    %c0_7 = arith.constant 0 : index
    %10 = vector.load %arg4[%c0_6, %c0_7] : memref<128x128xbf16, #tpu.memory_space<vmem>>, vector<128x128xbf16>
    %cst_8 = arith.constant dense<0.000000e+00> : vector<8x128xf32>
    %11 = tpu.matmul %9, %10, %cst_8 {dimension_numbers = #tpu.dot_dimension_numbers<[1], [0], [0], [1], [0, 0, 1, 1], [], []>} : vector<8x128xbf16>, vector<128x128xbf16>, vector<8x128xf32> -> vector<8x128xf32>
    %c0_9 = arith.constant 0 : index
    %c0_10 = arith.constant 0 : index
    %12 = vector.load %arg5[%c0_9, %c0_10] : memref<1x128xf32, #tpu.memory_space<vmem>>, vector<1x128xf32>
    %13 = vector.broadcast %12 : vector<1x128xf32> to vector<8x128xf32>
    %14 = arith.addf %11, %13 : vector<8x128xf32>
    %15 = arith.addf %14, %0 : vector<8x128xf32>
    %cst_11 = arith.constant dense<0.000000e+00> : vector<8xf32>
    %16 = vector.multi_reduction <add>, %15, %cst_11 [1] : vector<8x128xf32> to vector<8xf32>
    %17 = vector.shape_cast %16 : vector<8xf32> to vector<8x1xf32>
    %cst_12 = arith.constant 3.125000e-02 : f32
    %18 = vector.broadcast %cst_12 : f32 to vector<8x1xf32>
    %19 = arith.mulf %17, %18 : vector<8x1xf32>
    %20 = vector.broadcast %19 : vector<8x1xf32> to vector<8x128xf32>
    %21 = arith.subf %15, %20 : vector<8x128xf32>
    %22 = tpu.iota {dimensions = array<i32: 1>} : vector<8x128xi32>
    %c32_i32 = arith.constant 32 : i32
    %23 = vector.broadcast %c32_i32 : i32 to vector<8x128xi32>
    %24 = arith.cmpi slt, %22, %23 : vector<8x128xi32>
    %cst_13 = arith.constant 0.000000e+00 : f32
    %25 = vector.broadcast %cst_13 : f32 to vector<8x128xf32>
    %26 = arith.select %24, %21, %25 : vector<8x128xi1>, vector<8x128xf32>
    %27 = arith.mulf %26, %26 : vector<8x128xf32>
    %cst_14 = arith.constant dense<0.000000e+00> : vector<8xf32>
    %28 = vector.multi_reduction <add>, %27, %cst_14 [1] : vector<8x128xf32> to vector<8xf32>
    %29 = vector.shape_cast %28 : vector<8xf32> to vector<8x1xf32>
    %cst_15 = arith.constant 3.125000e-02 : f32
    %30 = vector.broadcast %cst_15 : f32 to vector<8x1xf32>
    %31 = arith.mulf %29, %30 : vector<8x1xf32>
    %cst_16 = arith.constant 9.99999997E-7 : f32
    %32 = vector.broadcast %cst_16 : f32 to vector<8x1xf32>
    %33 = arith.addf %31, %32 : vector<8x1xf32>
    %34 = math.rsqrt %33 : vector<8x1xf32>
    %35 = vector.broadcast %34 : vector<8x1xf32> to vector<8x128xf32>
    %36 = arith.mulf %26, %35 : vector<8x128xf32>
    %c0_17 = arith.constant 0 : index
    %c0_18 = arith.constant 0 : index
    %37 = vector.load %arg6[%c0_17, %c0_18] : memref<1x128xf32, #tpu.memory_space<vmem>>, vector<1x128xf32>
    %38 = vector.broadcast %37 : vector<1x128xf32> to vector<8x128xf32>
    %39 = arith.mulf %36, %38 : vector<8x128xf32>
    %c0_19 = arith.constant 0 : index
    %c0_20 = arith.constant 0 : index
    %40 = vector.load %arg7[%c0_19, %c0_20] : memref<1x128xf32, #tpu.memory_space<vmem>>, vector<1x128xf32>
    %41 = vector.broadcast %40 : vector<1x128xf32> to vector<8x128xf32>
    %42 = arith.addf %39, %41 : vector<8x128xf32>
    %c0_21 = arith.constant 0 : index
    %c0_22 = arith.constant 0 : index
    %43 = vector.load %arg8[%c0_21, %c0_22] : memref<8x128xf32, #tpu.memory_space<vmem>>, vector<8x128xf32>
    tpu.vector_store %arg8[%c0_21, %c0_22], %42 {strides = array<i32>} : memref<8x128xf32, #tpu.memory_space<vmem>>, vector<8x128xf32>,
    return
  }
  func.func @transform_0(%arg0: i32) -> (i32, i32) {
    %c0_i32 = arith.constant 0 : i32
    %c0_i32_0 = arith.constant 0 : i32
    return %arg0, %c0_i32 : i32, i32
  }
  func.func @transform_1(%arg0: i32) -> (i32, i32) {
    %c0_i32 = arith.constant 0 : i32
    %c0_i32_0 = arith.constant 0 : i32
    %c0_i32_1 = arith.constant 0 : i32
    return %c0_i32, %c0_i32_0 : i32, i32
  }
  func.func @transform_2(%arg0: i32) -> (i32, i32) {
    %c0_i32 = arith.constant 0 : i32
    %c0_i32_0 = arith.constant 0 : i32
    %c0_i32_1 = arith.constant 0 : i32
    return %c0_i32, %c0_i32_0 : i32, i32
  }
  func.func @transform_3(%arg0: i32) -> (i32, i32) {
    %c0_i32 = arith.constant 0 : i32
    %c0_i32_0 = arith.constant 0 : i32
    %c0_i32_1 = arith.constant 0 : i32
    return %c0_i32, %c0_i32_0 : i32, i32
  }
  func.func @transform_4(%arg0: i32) -> (i32, i32) {
    %c0_i32 = arith.constant 0 : i32
    %c0_i32_0 = arith.constant 0 : i32
    %c0_i32_1 = arith.constant 0 : i32
    return %c0_i32, %c0_i32_0 : i32, i32
  }
  func.func @transform_5(%arg0: i32) -> (i32, i32) {
    %c0_i32 = arith.constant 0 : i32
    %c0_i32_0 = arith.constant 0 : i32
    %c0_i32_1 = arith.constant 0 : i32
    return %c0_i32, %c0_i32_0 : i32, i32
  }
  func.func @transform_6(%arg0: i32) -> (i32, i32) {
    %c0_i32 = arith.constant 0 : i32
    %c0_i32_0 = arith.constant 0 : i32
    %c0_i32_1 = arith.constant 0 : i32
    return %c0_i32, %c0_i32_0 : i32, i32
  }
  func.func @transform_7(%arg0: i32) -> (i32, i32) {
    %c0_i32 = arith.constant 0 : i32
    %c0_i32_0 = arith.constant 0 : i32
    return %arg0, %c0_i32 : i32, i32
  }
}

module attributes {stable_mosaic.version = 11 : i64} {
  func.func @_ffn_kernel(%arg0: i32, %arg1: memref<8x128xf32, #tpu.memory_space<vmem>>, %arg2: memref<128x128xbf16, #tpu.memory_space<vmem>>, %arg3: memref<1x128xf32, #tpu.memory_space<vmem>>, %arg4: memref<128x128xbf16, #tpu.memory_space<vmem>>, %arg5: memref<1x128xf32, #tpu.memory_space<vmem>>, %arg6: memref<1x128xf32, #tpu.memory_space<vmem>>, %arg7: memref<1x128xf32, #tpu.memory_space<vmem>>, %arg8: memref<8x128xf32, #tpu.memory_space<vmem>>) attributes {dimension_semantics = [#tpu.dimension_semantics<parallel>], iteration_bounds = array<i64: 2>, scalar_prefetch = 0 : i64, scratch_operands = 0 : i64, tpu.core_type = #tpu.core_type<tc>, window_params = [{transform_indices = @transform_0, window_bounds = array<i64: 8, 128>}, {pipeline_mode = #tpu.pipeline_mode<synchronous>, transform_indices = @transform_1, window_bounds = array<i64: 128, 128>}, {pipeline_mode = #tpu.pipeline_mode<synchronous>, transform_indices = @transform_2, window_bounds = array<i64: 1, 128>}, {pipeline_mode = #tpu.pipeline_mode<synchronous>, transform_indices = @transform_3, window_bounds = array<i64: 128, 128>}, {pipeline_mode = #tpu.pipeline_mode<synchronous>, transform_indices = @transform_4, window_bounds = array<i64: 1, 128>}, {pipeline_mode = #tpu.pipeline_mode<synchronous>, transform_indices = @transform_5, window_bounds = array<i64: 1, 128>}, {pipeline_mode = #tpu.pipeline_mode<synchronous>, transform_indices = @transform_6, window_bounds = array<i64: 1, 128>}, {transform_indices = @transform_7, window_bounds = array<i64: 8, 128>}]} {
    %c0 = arith.constant 0 : index
    %c0_0 = arith.constant 0 : index
    %0 = vector.load %arg1[%c0, %c0_0] : memref<8x128xf32, #tpu.memory_space<vmem>>, vector<8x128xf32>
    %1 = arith.truncf %0 : vector<8x128xf32> to vector<8x128xbf16>
    %c0_1 = arith.constant 0 : index
    %c0_2 = arith.constant 0 : index
    %2 = vector.load %arg2[%c0_1, %c0_2] : memref<128x128xbf16, #tpu.memory_space<vmem>>, vector<128x128xbf16>
    %cst = arith.constant dense<0.000000e+00> : vector<8x128xf32>
    %3 = tpu.matmul %1, %2, %cst {dimension_numbers = #tpu.dot_dimension_numbers<[1], [0], [0], [1], [0, 0, 1, 1], [], []>} : vector<8x128xbf16>, vector<128x128xbf16>, vector<8x128xf32> -> vector<8x128xf32>
    %c0_3 = arith.constant 0 : index
    %c0_4 = arith.constant 0 : index
    %4 = vector.load %arg3[%c0_3, %c0_4] : memref<1x128xf32, #tpu.memory_space<vmem>>, vector<1x128xf32>
    %5 = vector.broadcast %4 : vector<1x128xf32> to vector<8x128xf32>
    %6 = arith.addf %3, %5 : vector<8x128xf32>
    %cst_5 = arith.constant 0.000000e+00 : f32
    %7 = vector.broadcast %cst_5 : f32 to vector<8x128xf32>
    %8 = arith.maximumf %6, %7 : vector<8x128xf32>
    %9 = arith.truncf %8 : vector<8x128xf32> to vector<8x128xbf16>
    %c0_6 = arith.constant 0 : index
    %c0_7 = arith.constant 0 : index
    %10 = vector.load %arg4[%c0_6, %c0_7] : memref<128x128xbf16, #tpu.memory_space<vmem>>, vector<128x128xbf16>
    %cst_8 = arith.constant dense<0.000000e+00> : vector<8x128xf32>
    %11 = tpu.matmul %9, %10, %cst_8 {dimension_numbers = #tpu.dot_dimension_numbers<[1], [0], [0], [1], [0, 0, 1, 1], [], []>} : vector<8x128xbf16>, vector<128x128xbf16>, vector<8x128xf32> -> vector<8x128xf32>
    %c0_9 = arith.constant 0 : index
    %c0_10 = arith.constant 0 : index
    %12 = vector.load %arg5[%c0_9, %c0_10] : memref<1x128xf32, #tpu.memory_space<vmem>>, vector<1x128xf32>
    %13 = vector.broadcast %12 : vector<1x128xf32> to vector<8x128xf32>
    %14 = arith.addf %11, %13 : vector<8x128xf32>
    %15 = arith.addf %14, %0 : vector<8x128xf32>
    %cst_11 = arith.constant dense<0.000000e+00> : vector<8xf32>
    %16 = vector.multi_reduction <add>, %15, %cst_11 [1] : vector<8x128xf32> to vector<8xf32>
    %17 = vector.shape_cast %16 : vector<8xf32> to vector<8x1xf32>
    %cst_12 = arith.constant 3.125000e-02 : f32
    %18 = vector.broadcast %cst_12 : f32 to vector<8x1xf32>
    %19 = arith.mulf %17, %18 : vector<8x1xf32>
    %20 = vector.broadcast %19 : vector<8x1xf32> to vector<8x128xf32>
    %21 = arith.subf %15, %20 : vector<8x128xf32>
    %22 = tpu.iota {dimensions = array<i32: 1>} : vector<8x128xi32>
    %c32_i32 = arith.constant 32 : i32
    %23 = vector.broadcast %c32_i32 : i32 to vector<8x128xi32>
    %24 = arith.cmpi slt, %22, %23 : vector<8x128xi32>
    %cst_13 = arith.constant 0.000000e+00 : f32
    %25 = vector.broadcast %cst_13 : f32 to vector<8x128xf32>
    %26 = arith.select %24, %21, %25 : vector<8x128xi1>, vector<8x128xf32>
    %27 = arith.mulf %26, %26 : vector<8x128xf32>
    %cst_14 = arith.constant dense<0.000000e+00> : vector<8xf32>
    %28 = vector.multi_reduction <add>, %27, %cst_14 [1] : vector<8x128xf32> to vector<8xf32>
    %29 = vector.shape_cast %28 : vector<8xf32> to vector<8x1xf32>
    %cst_15 = arith.constant 3.125000e-02 : f32
    %30 = vector.broadcast %cst_15 : f32 to vector<8x1xf32>
    %31 = arith.mulf %29, %30 : vector<8x1xf32>
    %cst_16 = arith.constant 9.99999997E-7 : f32
    %32 = vector.broadcast %cst_16 : f32 to vector<8x1xf32>
    %33 = arith.addf %31, %32 : vector<8x1xf32>
    %34 = math.rsqrt %33 : vector<8x1xf32>
    %35 = vector.broadcast %34 : vector<8x1xf32> to vector<8x128xf32>
    %36 = arith.mulf %26, %35 : vector<8x128xf32>
    %c0_17 = arith.constant 0 : index
    %c0_18 = arith.constant 0 : index
    %37 = vector.load %arg6[%c0_17, %c0_18] : memref<1x128xf32, #tpu.memory_space<vmem>>, vector<1x128xf32>
    %38 = vector.broadcast %37 : vector<1x128xf32> to vector<8x128xf32>
    %39 = arith.mulf %36, %38 : vector<8x128xf32>
    %c0_19 = arith.constant 0 : index
    %c0_20 = arith.constant 0 : index
    %40 = vector.load %arg7[%c0_19, %c0_20] : memref<1x128xf32, #tpu.memory_space<vmem>>, vector<1x128xf32>
    %41 = vector.broadcast %40 : vector<1x128xf32> to vector<8x128xf32>
    %42 = arith.addf %39, %41 : vector<8x128xf32>
    %c0_21 = arith.constant 0 : index
    %c0_22 = arith.constant 0 : index
    %43 = vector.load %arg8[%c0_21, %c0_22] : memref<8x128xf32, #tpu.memory_space<vmem>>, vector<8x128xf32>
    tpu.vector_store %arg8[%c0_21, %c0_22], %42 {strides = array<i32>} : memref<8x128xf32, #tpu.memory_space<vmem>>, vector<8x128xf32>,
    return
  }
  func.func @transform_0(%arg0: i32) -> (i32, i32) {
    %c0_i32 = arith.constant 0 : i32
    %c0_i32_0 = arith.constant 0 : i32
    return %arg0, %c0_i32 : i32, i32
  }
  func.func @transform_1(%arg0: i32) -> (i32, i32) {
    %c0_i32 = arith.constant 0 : i32
    %c0_i32_0 = arith.constant 0 : i32
    %c0_i32_1 = arith.constant 0 : i32
    return %c0_i32, %c0_i32_0 : i32, i32
  }
  func.func @transform_2(%arg0: i32) -> (i32, i32) {
    %c0_i32 = arith.constant 0 : i32
    %c0_i32_0 = arith.constant 0 : i32
    %c0_i32_1 = arith.constant 0 : i32
    return %c0_i32, %c0_i32_0 : i32, i32
  }
  func.func @transform_3(%arg0: i32) -> (i32, i32) {
    %c0_i32 = arith.constant 0 : i32
    %c0_i32_0 = arith.constant 0 : i32
    %c0_i32_1 = arith.constant 0 : i32
    return %c0_i32, %c0_i32_0 : i32, i32
  }
  func.func @transform_4(%arg0: i32) -> (i32, i32) {
    %c0_i32 = arith.constant 0 : i32
    %c0_i32_0 = arith.constant 0 : i32
    %c0_i32_1 = arith.constant 0 : i32
    return %c0_i32, %c0_i32_0 : i32, i32
  }
  func.func @transform_5(%arg0: i32) -> (i32, i32) {
    %c0_i32 = arith.constant 0 : i32
    %c0_i32_0 = arith.constant 0 : i32
    %c0_i32_1 = arith.constant 0 : i32
    return %c0_i32, %c0_i32_0 : i32, i32
  }
  func.func @transform_6(%arg0: i32) -> (i32, i32) {
    %c0_i32 = arith.constant 0 : i32
    %c0_i32_0 = arith.constant 0 : i32
    %c0_i32_1 = arith.constant 0 : i32
    return %c0_i32, %c0_i32_0 : i32, i32
  }
  func.func @transform_7(%arg0: i32) -> (i32, i32) {
    %c0_i32 = arith.constant 0 : i32
    %c0_i32_0 = arith.constant 0 : i32
    return %arg0, %c0_i32 : i32, i32
  }
}

</mosaic_0001>

<bundles_post_ra>
// kernel: tpu_custom_call.1
= control target key start
LH: loop header
LB: loop body
LE: loop exit
PB: predicated region body
PF: predicated region fallthrough
CT: control target
= control target key end

     0   :  { %12 = vsyncpa [#allocation3], 0  ;;  %s1323_s0 = inlined_call_operand.hbm [shape: f32[16,128], index: 0, kind: input, shape index: {}]   ;;  %s1324_s1 = inlined_call_operand.hbm [shape: bf16[128,128], index: 1, kind: input, shape index: {}]   ;;  %s1325_s2 = inlined_call_operand.vmem [shape: f32[1,128], index: 2, kind: input, shape index: {}]   ;;  %s1326_s3 = inlined_call_operand.hbm [shape: bf16[128,128], index: 3, kind: input, shape index: {}]   ;;  %s1327_s4 = inlined_call_operand.vmem [shape: f32[1,128], index: 4, kind: input, shape index: {}]   ;;  %s1328_s5 = inlined_call_operand.vmem [shape: f32[1,128], index: 5, kind: input, shape index: {}]   ;;  %s1329_s6 = inlined_call_operand.vmem [shape: f32[1,128], index: 6, kind: input, shape index: {}]   ;;  %s1330_s7 = inlined_call_operand.hbm [shape: f32[16,128], index: 7, kind: output, shape index: {}]  }
   0x1   :  { %14 = vsyncpa [#allocation3 + $0x1], 0 }
   0x2   :  { %15 = vsyncpa [#allocation6], 0 }
   0x3   :  { %16 = vsyncpa [#allocation4], 0 }
   0x4   :  { %18 = vsyncpa [#allocation4 + $0x1], 0  ;;  %s1075_s24 = smov 0   ;;  %s1077_s25 = smov 0  }
   0x5   :  { %s1079_s26 = smov 0   ;;  %s1081_s27 = smov 0  }
   0x6 LB: > { %s1096_s28 = sadd.s32 4294967295, %s1025_s27   ;;  %s686_s29 = sadd.s32 4294967294, %s1025_s27   ;;  %s1025_s27 = sphi %s1081_s27, %s1350_s27   ;;  %s1021_s26 = sphi %s1079_s26, %s1349_s26   ;;  %s1017_s25 = sphi %s1077_s25, %s1348_s25   ;;  %s1013_s24 = sphi %s1075_s24, %s1347_s24  }
   0x7   : > { %p44_p0 = scmp.ne.s32.totalorder %s1017_s25, %s1013_s24  ;;  %p1331_p1 = scmp.eq.s32.totalorder %s1096_s28, 0 }
   0x8   : > { %p200_p3 = scmp.eq.s32.totalorder %s686_s29, 1  ;;  %p687_p5 = scmp.ge.s32.totalorder %s1025_s27, 1 }
   0x9   : > { %p1105_p4 = por %p1331_p1, %p44_p0  ;;  %p207_p7 = scmp.lt.s32.totalorder %s1025_s27, 3 }
   0xa   : > { %p1110_p6 = por %p200_p3, %p44_p0  ;;  %s1027_s10 = smov [#allocation5]  }
   0xb   : > { %s1334_s30 = scalar_select %p1105_p4, 1, 0 }
   0xc   : > { %s1335_s8 = scalar_select %p1110_p6, 1, 0 }
   0xd   : > { %p1115_p8 = pnand %p687_p5, %p207_p7  ;;  %s219_s11 = sshll.u32 %s1027_s10, 4  ;;  %s1119_s11 = int_to_ptr.vmem [resolvable:$true] %s219_s11 }
   0xe   : > { %s1028_s13 = smov [#allocation7]   ;;  %s869_s17 = scalar_lea.hbm %s1324_s1, 1024 }
   0xf   : > { %p792_p9 = pneg %p1115_p8  ;;  %s235_s14 = sshll.u32 %s1028_s13, 4  ;;  %s1130_s14 = int_to_ptr.vmem [resolvable:$true] %s235_s14 }
  0x10   : > { %p870_p12 = scmp.ne.s32.totalorder %s1324_s1, %s869_s17  ;;  %p876_p5 = scmp.lt.u32.totalorder %s869_s17, %s1324_s1 }
  0x11   : > { %p1126_p11 = pnand %p792_p9, %p1331_p1 }
  0x13   : > { %p871_p13 = pneg %p1126_p11 }
  0x15   : > { %p872_p0 = pnand %p871_p13, %p870_p12 }
  0x17   : > { %p873_p3 = pneg %p872_p0 }
  0x19   : > { %p878_p7 = pnand %p876_p5, %p873_p3 }
  0x1b   : > { %881 = shalt.err (!%p878_p7)
}
  0x1c   : > { %s882_s22 = scalar_lea.vmem %s1119_s11, 1024  ;;  %p890_p2 = scmp.lt.s32.totalorder %s1119_s11, %s1119_s11 }
  0x1d   : > { %p883_p9 = scmp.ne.s32.totalorder %s1119_s11, %s882_s22  ;;  %p891_p12 = scmp.lt.s32.totalorder %s882_s22, %s882_s22 }
  0x1f   : > { %p885_p10 = pnand %p883_p9, %p871_p13  ;;  %p892_p0 = por %p891_p12, %p890_p2 }
  0x21   : > { %p886_p1 = pneg %p885_p10 }
  0x23   : > { %p893_p6 = pnand %p892_p0, %p886_p1 }
  0x25   : > { %896 = shalt.err (!%p893_p6)
}
  0x26   : > { %s1029_s23 = smov 64   ;;  %s1030_s29 = smov 4  }
  0x27   : > { %795 = dma.hbm_to_vmem [thread:$0]  (!%p1126_p11), %s1324_s1, 1024, %s1119_s11, [#allocation6], %s1029_s23, %s1029_s23, %s1030_s29  }
  0x28   : > { %s897_s17 = scalar_lea.hbm %s1326_s3, 1024 }
  0x29   : > { %p898_p2 = scmp.ne.s32.totalorder %s1326_s3, %s897_s17  ;;  %p904_p10 = scmp.lt.u32.totalorder %s897_s17, %s1326_s3 }
  0x2b   : > { %p900_p1 = pnand %p898_p2, %p871_p13 }
  0x2d   : > { %p901_p6 = pneg %p900_p1 }
  0x2f   : > { %p906_p3 = pnand %p904_p10, %p901_p6 }
  0x31   : > { %909 = shalt.err (!%p906_p3)
}
  0x32   : > { %s910_s11 = scalar_lea.vmem %s1130_s14, 1024  ;;  %p918_p12 = scmp.lt.s32.totalorder %s1130_s14, %s1130_s14 }
  0x33   : > { %p911_p5 = scmp.ne.s32.totalorder %s1130_s14, %s910_s11  ;;  %p919_p0 = scmp.lt.s32.totalorder %s910_s11, %s910_s11 }
  0x35   : > { %p913_p7 = pnand %p911_p5, %p871_p13  ;;  %p920_p2 = por %p919_p0, %p918_p12 }
  0x37   : > { %p914_p9 = pneg %p913_p7 }
  0x39   : > { %p921_p1 = pnand %p920_p2, %p914_p9 }
  0x3b   : > { %924 = shalt.err (!%p921_p1)
}
  0x3c   : > { %798 = dma.hbm_to_vmem [thread:$0]  (!%p1126_p11), %s1326_s3, 1024, %s1130_s14, [#allocation6], %s1029_s23, %s1029_s23, %s1030_s29  }
  0x3d   : > { %s1185_s13 = sadd.s32 1, %s1025_s27   ;;  %s31_s12 = sadd.s32 1, %s1021_s26 }
  0x3e   : > { %s28_s15 = ssub.s32 %s1025_s27, %s1185_s13  ;;  %p38_p13 = scmp.ne.s32.totalorder %s1021_s26, %s1017_s25 }
  0x3f   : > { %p29_p6 = scmp.eq.s32.totalorder %s28_s15, 0  ;;  %p39_p10 = scmp.eq.s32.totalorder %s1025_s27, 0 }
  0x40   : > { %p1338_p3 = scmp.eq.s32.totalorder %s1096_s28, 1  ;;  %p809_p7 = scmp.lt.s32.totalorder %s1025_s27, 2 }
  0x41   : > { %s1201_s17 = scalar_select %p29_p6, %s1021_s26, %s31_s12  }
  0x42   : > { %p1195_p5 = por %p1338_p3, %p38_p13  ;;  %p40_p9 = por %p39_p10, %p38_p13 }
  0x43   : > { %s258_s18 = sand.u32 1, %s1021_s26   ;;  %s692_s14 = sshll.u32 %s1025_s27, 7 }
  0x44   : > { %s1339_s16 = scalar_select %p1195_p5, 1, 0 }
  0x45   : > { %s691_s19 = sshll.u32 %s258_s18, 3  ;;  %s1208_s20 = scalar_lea.hbm %s1323_s0, %s692_s14 }
  0x46   : > { %s262_s21 = scalar_lea.vmem [#allocation2], %s691_s19  ;;  %p1212_p11 = pnand %p809_p7, %p40_p9 }
  0x47   : > { %s269_s11 = sshll.u32 %s262_s21, 4  ;;  %s259_s10 = scalar_lea.sflag [#allocation3], %s258_s18  ;;  %s1210_s11 = int_to_ptr.vmem [resolvable:$true] %s269_s11 }
  0x48   : > { %s925_s12 = scalar_lea.hbm %s1208_s20, 128  ;;  %p927_p0 = pneg %p1212_p11 }
  0x49   : > { %p926_p12 = scmp.ne.s32.totalorder %s1208_s20, %s925_s12  ;;  %s930_s14 = scalar_lea.hbm %s1323_s0, 256 }
  0x4a   : > { %p931_p13 = scmp.lt.u32.totalorder %s1208_s20, %s1323_s0  ;;  %p932_p6 = scmp.lt.u32.totalorder %s930_s14, %s925_s12 }
  0x4b   : > { %p928_p2 = pnand %p927_p0, %p926_p12  ;;  %p934_p3 = scmp.lt.u32.totalorder %s925_s12, %s1208_s20 }
  0x4c   : > { %p933_p10 = por %p932_p6, %p931_p13 }
  0x4d   : > { %p929_p1 = pneg %p928_p2 }
  0x4e   : > { %p935_p7 = por %p934_p3, %p933_p10 }
  0x50   : > { %p936_p9 = pnand %p935_p7, %p929_p1 }
  0x52   : > { %939 = shalt.err (!%p936_p9)
}
  0x53   : > { %s940_s18 = scalar_lea.vmem %s1210_s11, 128  ;;  %s1031_s21 = smov [#allocation2]  }
  0x54   : > { %p941_p12 = scmp.ne.s32.totalorder %s1210_s11, %s940_s18  ;;  %s945_s15 = sshll.u32 %s1031_s21, 4  ;;  %s946_s15 = int_to_ptr.vmem [resolvable:$false] %s945_s15 }
  0x55   : > { %s947_s19 = scalar_lea.vmem %s946_s15, 256  ;;  %p948_p4 = scmp.lt.s32.totalorder %s1210_s11, %s946_s15 }
  0x56   : > { %p943_p2 = pnand %p941_p12, %p927_p0  ;;  %p949_p13 = scmp.lt.s32.totalorder %s947_s19, %s940_s18 }
  0x58   : > { %p944_p5 = pneg %p943_p2  ;;  %p950_p6 = por %p949_p13, %p948_p4 }
  0x5a   : > { %p951_p10 = pnand %p950_p6, %p944_p5 }
  0x5c   : > { %954 = shalt.err (!%p951_p10)
}
  0x5d   : > { %802 = dma.hbm_to_vmem [thread:$0]  (!%p1212_p11), %s1208_s20, 128, %s1210_s11, %s259_s10  }
  0x5e   : > { %278 = sbr.rel (%p1115_p8) target bundleno = 899 (0x383), region = 48  ;;  %s1244_s12 = sand.u32 (!%p1115_p8), 1, %s1017_s25  }
  0x5f   : > { %s694_s14 = sshll.u32 (!%p1115_p8), %s1244_s12, 3  ;;  %s281_s23 = scalar_lea.sflag (!%p1115_p8), [#allocation3], %s1244_s12 }
  0x60   : > { %s1250_s29 = scalar_lea.vmem (!%p1115_p8), [#allocation2], %s694_s14  ;;  %p1341_p4 = scmp.ne.s32.totalorder (!%p1115_p8), %s1334_s30, 0 }
  0x65   : > { %1000 = dma.done.wait (%p1341_p4), %s281_s23, 128  }
  0x66   : > { %1002 = vsyncadd (%p1341_p4), %s281_s23, 4294967168  ;;  %p1342_p5 = scmp.eq.s32.totalorder %s1096_s28, 0 }
  0x68   : > { %1004 = dma.done.wait (%p1342_p5), [#allocation6], 2048   ;;  %p1343_p8 = pmov %p1342_p5 }
  0x69   : > { %v1032_v0 = vmov 0.0   ;;  %vm1033_vm0 = vmmov 0   ;;  %v851_v1 = vld [vmem:[#allocation5] sm:$0xff]   ;;  %v852_v2 = vld [vmem:[#allocation5 + $0x8] sm:$0xff]   ;;  %v853_v3 = vld [vmem:[#allocation5 + $0x10] sm:$0xff]   ;;  %v555_v34 = vlaneseq  ;;  %s719_s15 = sshll.u32 %s1096_s28, 7 }
  0x6a   : > { %1006 = vsyncadd (%p1343_p8), [#allocation6], 4294965248  ;;  %740 = vmatprep.subr.bf16.mxu0 %v1032_v0  ;;  %756 = vmatprep.mubr.msk.bf16.mxu0 %vm1033_vm0, %v1032_v0  ;;  %v859_v4 = vld [vmem:[#allocation7] sm:$0xff]   ;;  %v854_v5 = vld [vmem:[#allocation5 + $0x18] sm:$0xff]   ;;  %s322_s19 = scalar_lea.vmem [#allocation8], %s694_s14  ;;  %s1279_s9 = scalar_lea.hbm %s1330_s7, %s719_s15 }
  0x6b   : > { %760 = vmatprep.subr.bf16.mxu1 %v1032_v0  ;;  %776 = vmatprep.mubr.msk.bf16.mxu1 %vm1033_vm0, %v1032_v0  ;;  %v860_v6 = vld [vmem:[#allocation7 + $0x8] sm:$0xff]   ;;  %v855_v7 = vld [vmem:[#allocation5 + $0x20] sm:$0xff]   ;;  %v861_v8 = vld [vmem:[#allocation7 + $0x10] sm:$0xff]   ;;  %v556_v35 = vand.u32 127, %v555_v34  ;;  %s597_s23 = sshll.u32 %s322_s19, 4  ;;  %s584_s20 = scalar_lea.sflag [#allocation4], %s1244_s12  ;;  %s1281_s23 = int_to_ptr.vmem [resolvable:$true] %s597_s23 }
  0x6c   : > { %741 = vmatpush3.bf16.msra.mxu0 %v851_v1  ;;  %761 = vmatpush3.bf16.msra.mxu1 %v859_v4  ;;  %v856_v9 = vld [vmem:[#allocation5 + $0x28] sm:$0xff]   ;;  %v862_v10 = vld [vmem:[#allocation7 + $0x18] sm:$0xff]   ;;  %v857_v11 = vld [vmem:[#allocation5 + $0x30] sm:$0xff]   ;;  %s955_s11 = scalar_lea.vmem %s1281_s23, 128  ;;  %p1344_p0 = scmp.ne.s32.totalorder %s1339_s16, 0 }
  0x6d   : > { %742 = vmatprep.subr.bf16.mxu0 %v1032_v0  ;;  %762 = vmatprep.subr.bf16.mxu1 %v1032_v0  ;;  %v863_v12 = vld [vmem:[#allocation7 + $0x20] sm:$0xff]   ;;  %v858_v13 = vld [vmem:[#allocation5 + $0x38] sm:$0xff]   ;;  %v864_v15 = vld [vmem:[#allocation7 + $0x28] sm:$0xff]   ;;  %vm557_vm1 = vcmp.lt.s32.totalorder %v556_v35, 32  ;;  %p956_p11 = scmp.ne.s32.totalorder %s1281_s23, %s955_s11  ;;  %s1034_s28 = smov [#allocation8]  }
  0x6e   : > { %v324_v14 = vld [vmem:[%s1250_s29] sm:$0xff]  ;;  %s959_s14 = sshll.u32 %s1034_s28, 4  ;;  %s960_s14 = int_to_ptr.vmem [resolvable:$false] %s959_s14 }
  0x6f   : > { %v325_v16 = vpack.c.bf16 %v324_v14, %v324_v14  ;;  %v865_v17 = vld [vmem:[#allocation7 + $0x30] sm:$0xff]   ;;  %v866_v18 = vld [vmem:[#allocation7 + $0x38] sm:$0xff]   ;;  %p957_p1 = pnand %p956_p11, %p1344_p0  ;;  %s961_s22 = scalar_lea.vmem %s960_s14, 256 }
  0x70   : > { %743 = vmatpush3.bf16.msra.mxu0 %v852_v2  ;;  %763 = vmatpush3.bf16.msra.mxu1 %v860_v6  ;;  %v698_v19 = vld [vmem:[%s1325_s2] ss:$0 sm:$0xff]  ;;  %p962_p7 = scmp.lt.s32.totalorder %s1281_s23, %s960_s14  ;;  %p963_p9 = scmp.lt.s32.totalorder %s961_s22, %s955_s11 }
  0x71   : > { %744 = vmatprep.subr.bf16.mxu0 %v1032_v0  ;;  %764 = vmatprep.subr.bf16.mxu1 %v1032_v0  ;;  %v707_v27 = vld [vmem:[%s1327_s4] ss:$0 sm:$0xff]  ;;  %p958_p3 = pneg %p957_p1 }
  0x72   : > { %v716_v45 = vld [vmem:[%s1328_s5] ss:$0 sm:$0xff]  ;;  %p964_p12 = por %p963_p9, %p962_p7 }
  0x73   : > { %v717_v47 = vld [vmem:[%s1329_s6] ss:$0 sm:$0xff] }
  0x74   : > { %745 = vmatpush3.bf16.msra.mxu0 %v853_v3  ;;  %765 = vmatpush3.bf16.msra.mxu1 %v861_v8  ;;  %p965_p2 = pnand %p964_p12, %p958_p3 }
  0x75   : > { %746 = vmatprep.subr.bf16.mxu0 %v1032_v0  ;;  %766 = vmatprep.subr.bf16.mxu1 %v1032_v0 }
  0x78   : > { %747 = vmatpush3.bf16.msra.mxu0 %v854_v5  ;;  %767 = vmatpush3.bf16.msra.mxu1 %v862_v10 }
  0x79   : > { %748 = vmatprep.subr.bf16.mxu0 %v1032_v0  ;;  %768 = vmatprep.subr.bf16.mxu1 %v1032_v0 }
  0x7c   : > { %749 = vmatpush3.bf16.msra.mxu0 %v855_v7  ;;  %769 = vmatpush3.bf16.msra.mxu1 %v863_v12 }
  0x7d   : > { %750 = vmatprep.subr.bf16.mxu0 %v1032_v0  ;;  %770 = vmatprep.subr.bf16.mxu1 %v1032_v0 }
  0x80   : > { %751 = vmatpush3.bf16.msra.mxu0 %v856_v9  ;;  %771 = vmatpush3.bf16.msra.mxu1 %v864_v15 }
  0x81   : > { %752 = vmatprep.subr.bf16.mxu0 %v1032_v0  ;;  %772 = vmatprep.subr.bf16.mxu1 %v1032_v0 }
  0x84   : > { %753 = vmatpush3.bf16.msra.mxu0 %v857_v11  ;;  %773 = vmatpush3.bf16.msra.mxu1 %v865_v17 }
  0x85   : > { %754 = vmatprep.subr.bf16.mxu0 %v1032_v0  ;;  %774 = vmatprep.subr.bf16.mxu1 %v1032_v0 }
  0x88   : > { %755 = vmatpush3.bf16.msra.mxu0 %v858_v13  ;;  %775 = vmatpush3.bf16.msra.mxu1 %v866_v18 }
  0x8b   : > { %757 = vmatmul.mubr.bf16.vlgmr.msra.gmra.mrb[0].mxu0 %v325_v16 }
 0x15e   : > { %v431_v20 = vpop.f32.mrb[0].mxu0 }
 0x15f   : > { %v432_v21 = vadd.f32 %v698_v19, %v431_v20  ;;  %v758_v22 = vpop.f32.mrb[1].mxu0 }
 0x160   : > { %v434_v23 = vpop.f32.mrb[2].mxu0 }
 0x161   : > { %v437_v24 = vmax.f32 %v432_v21, 0.0  ;;  %v759_v25 = vpop.f32.mrb[3].mxu0 }
 0x163   : > { %v438_v26 = vpack.c.bf16 %v437_v24, %v437_v24 }
 0x165   : > { %777 = vmatmul.mubr.bf16.vlgmr.msra.gmra.mrb[0].mxu1 %v438_v26 }
 0x238   : > { %v544_v28 = vpop.f32.mrb[0].mxu1 }
 0x239   : > { %v545_v29 = vadd.f32 %v707_v27, %v544_v28  ;;  %v778_v30 = vpop.f32.mrb[1].mxu1 }
 0x23a   : > { %v547_v31 = vpop.f32.mrb[2].mxu1 }
 0x23b   : > { %v779_v32 = vpop.f32.mrb[3].mxu1  ;;  %v550_v33 = vadd.f32 %v545_v29, %v324_v14 }
 0x23d   : > { %551 = vadd.xlane.f32.xlu0 %v550_v33 }
 0x2ca   : > { %v552_v36 = vpop.xlane.xlu0 %551 }
 0x2cb   : > { %v553_v37 = vmul.f32 0.03125, %v552_v36 }
 0x2cd   : > { %v554_v38 = vsub.f32 %v550_v33, %v553_v37 }
 0x2cf   : > { %v558_v39 = vsel %vm557_vm1, %v554_v38, 0.0 }
 0x2d0   : > { %v559_v40 = vmul.f32 %v558_v39, %v558_v39 }
 0x2d2   : > { %560 = vadd.xlane.f32.xlu0 %v559_v40 }
 0x35f   : > { %v561_v41 = vpop.xlane.xlu0 %560 }
 0x360   : > { %v562_v42 = vmul.f32 0.03125, %v561_v41 }
 0x362   : > { %v563_v43 = vadd.f32 1e-06, %v562_v42 }
 0x364   : > { %867 = vrsqrt.f32 %v563_v43 }
 0x36e   : > { %v868_v44 = vpop.eup %867 }
 0x36f   : > { %v565_v46 = vmul.f32 %v868_v44, %v558_v39 }
 0x371   : > { %v573_v48 = vmul.f32 %v716_v45, %v565_v46 }
 0x373   : > { %v581_v49 = vadd.f32 %v717_v47, %v573_v48 }
 0x375   : > { %582 = vst [vmem:[%s322_s19] sm:$0xff] %v581_v49 }
 0x376   : > { %968 = shalt.err (!%p965_p2)
}
 0x377   : > { %s969_s12 = scalar_lea.hbm %s1279_s9, 128  ;;  %s973_s21 = scalar_lea.hbm %s1330_s7, 256 }
 0x378   : > { %p970_p13 = scmp.ne.s32.totalorder %s1279_s9, %s969_s12  ;;  %p974_p4 = scmp.lt.u32.totalorder %s1279_s9, %s1330_s7 }
 0x379   : > { %p975_p5 = scmp.lt.u32.totalorder %s973_s21, %s969_s12  ;;  %p977_p11 = scmp.lt.u32.totalorder %s969_s12, %s1279_s9 }
 0x37a   : > { %p971_p6 = pnand %p970_p13, %p1344_p0 }
 0x37b   : > { %p976_p8 = por %p975_p5, %p974_p4 }
 0x37c   : > { %p972_p10 = pneg %p971_p6 }
 0x37d   : > { %p978_p1 = por %p977_p11, %p976_p8 }
 0x37f   : > { %p979_p3 = pnand %p978_p1, %p972_p10 }
 0x381   : > { %982 = shalt.err (!%p979_p3)
}
 0x382   : > { %790 = dma.vmem_to_hbm [thread:$0]  (%p1344_p0), %s1281_s23, 128, %s1279_s9, %s584_s20  }
 0x383 PF: > { %s609_s29 = sand.u32 1, %s1013_s24   ;;  %p1345_p7 = scmp.ne.s32.totalorder %s1335_s8, 0 }
 0x384   : > { %p1346_p9 = scmp.ge.s32.totalorder %s1025_s27, 2  ;;  %s610_s30 = scalar_lea.sflag [#allocation4], %s609_s29 }
 0x386   : > { %p804_p12 = pnand %p1346_p9, %p1345_p7 }
 0x388   : > { %1008 = dma.done.wait (!%p804_p12), %s610_s30, 128  }
 0x389   : > { %1010 = vsyncadd (!%p804_p12), %s610_s30, 4294967168  ;;  %p21_p2 = scmp.ge.s32.totalorder %s1185_s13, 4   ;;  %s1347_s24 = smov %s1017_s25 }
 0x38a   : > { %s1348_s25 = smov %s1021_s26  ;;  %s1349_s26 = smov %s1201_s17 }
 0x38b   : > { %s1350_s27 = smov %s1185_s13  ;;  %23 = sbr.rel (!%p21_p2) target bundleno = 6 (0x6), region = 101 }
 0x392   :  { %615 = vsyncpa [#allocation3], 1 }
 0x393   :  { %617 = vsyncpa [#allocation3 + $0x1], 1 }
 0x394   :  { %618 = vsyncpa [#allocation6], 1 }
 0x395   :  { %619 = vsyncpa [#allocation4], 1 }
 0x396   :  { %621 = vsyncpa [#allocation4 + $0x1], 1 }

// kernel: tpu_custom_call.1
= control target key start
LH: loop header
LB: loop body
LE: loop exit
PB: predicated region body
PF: predicated region fallthrough
CT: control target
= control target key end

     0   :  { %12 = vsyncpa [#allocation3], 0  ;;  %s1323_s0 = inlined_call_operand.hbm [shape: f32[16,128], index: 0, kind: input, shape index: {}]   ;;  %s1324_s1 = inlined_call_operand.hbm [shape: bf16[128,128], index: 1, kind: input, shape index: {}]   ;;  %s1325_s2 = inlined_call_operand.vmem [shape: f32[1,128], index: 2, kind: input, shape index: {}]   ;;  %s1326_s3 = inlined_call_operand.hbm [shape: bf16[128,128], index: 3, kind: input, shape index: {}]   ;;  %s1327_s4 = inlined_call_operand.vmem [shape: f32[1,128], index: 4, kind: input, shape index: {}]   ;;  %s1328_s5 = inlined_call_operand.vmem [shape: f32[1,128], index: 5, kind: input, shape index: {}]   ;;  %s1329_s6 = inlined_call_operand.vmem [shape: f32[1,128], index: 6, kind: input, shape index: {}]   ;;  %s1330_s7 = inlined_call_operand.hbm [shape: f32[16,128], index: 7, kind: output, shape index: {}]  }
   0x1   :  { %14 = vsyncpa [#allocation3 + $0x1], 0 }
   0x2   :  { %15 = vsyncpa [#allocation6], 0 }
   0x3   :  { %16 = vsyncpa [#allocation4], 0 }
   0x4   :  { %18 = vsyncpa [#allocation4 + $0x1], 0  ;;  %s1075_s24 = smov 0   ;;  %s1077_s25 = smov 0  }
   0x5   :  { %s1079_s26 = smov 0   ;;  %s1081_s27 = smov 0  }
   0x6 LB: > { %s1096_s28 = sadd.s32 4294967295, %s1025_s27   ;;  %s686_s29 = sadd.s32 4294967294, %s1025_s27   ;;  %s1025_s27 = sphi %s1081_s27, %s1350_s27   ;;  %s1021_s26 = sphi %s1079_s26, %s1349_s26   ;;  %s1017_s25 = sphi %s1077_s25, %s1348_s25   ;;  %s1013_s24 = sphi %s1075_s24, %s1347_s24  }
   0x7   : > { %p44_p0 = scmp.ne.s32.totalorder %s1017_s25, %s1013_s24  ;;  %p1331_p1 = scmp.eq.s32.totalorder %s1096_s28, 0 }
   0x8   : > { %p200_p3 = scmp.eq.s32.totalorder %s686_s29, 1  ;;  %p687_p5 = scmp.ge.s32.totalorder %s1025_s27, 1 }
   0x9   : > { %p1105_p4 = por %p1331_p1, %p44_p0  ;;  %p207_p7 = scmp.lt.s32.totalorder %s1025_s27, 3 }
   0xa   : > { %p1110_p6 = por %p200_p3, %p44_p0  ;;  %s1027_s10 = smov [#allocation5]  }
   0xb   : > { %s1334_s30 = scalar_select %p1105_p4, 1, 0 }
   0xc   : > { %s1335_s8 = scalar_select %p1110_p6, 1, 0 }
   0xd   : > { %p1115_p8 = pnand %p687_p5, %p207_p7  ;;  %s219_s11 = sshll.u32 %s1027_s10, 4  ;;  %s1119_s11 = int_to_ptr.vmem [resolvable:$true] %s219_s11 }
   0xe   : > { %s1028_s13 = smov [#allocation7]   ;;  %s869_s17 = scalar_lea.hbm %s1324_s1, 1024 }
   0xf   : > { %p792_p9 = pneg %p1115_p8  ;;  %s235_s14 = sshll.u32 %s1028_s13, 4  ;;  %s1130_s14 = int_to_ptr.vmem [resolvable:$true] %s235_s14 }
  0x10   : > { %p870_p12 = scmp.ne.s32.totalorder %s1324_s1, %s869_s17  ;;  %p876_p5 = scmp.lt.u32.totalorder %s869_s17, %s1324_s1 }
  0x11   : > { %p1126_p11 = pnand %p792_p9, %p1331_p1 }
  0x13   : > { %p871_p13 = pneg %p1126_p11 }
  0x15   : > { %p872_p0 = pnand %p871_p13, %p870_p12 }
  0x17   : > { %p873_p3 = pneg %p872_p0 }
  0x19   : > { %p878_p7 = pnand %p876_p5, %p873_p3 }
  0x1b   : > { %881 = shalt.err (!%p878_p7)
}
  0x1c   : > { %s882_s22 = scalar_lea.vmem %s1119_s11, 1024  ;;  %p890_p2 = scmp.lt.s32.totalorder %s1119_s11, %s1119_s11 }
  0x1d   : > { %p883_p9 = scmp.ne.s32.totalorder %s1119_s11, %s882_s22  ;;  %p891_p12 = scmp.lt.s32.totalorder %s882_s22, %s882_s22 }
  0x1f   : > { %p885_p10 = pnand %p883_p9, %p871_p13  ;;  %p892_p0 = por %p891_p12, %p890_p2 }
  0x21   : > { %p886_p1 = pneg %p885_p10 }
  0x23   : > { %p893_p6 = pnand %p892_p0, %p886_p1 }
  0x25   : > { %896 = shalt.err (!%p893_p6)
}
  0x26   : > { %s1029_s23 = smov 64   ;;  %s1030_s29 = smov 4  }
  0x27   : > { %795 = dma.hbm_to_vmem [thread:$0]  (!%p1126_p11), %s1324_s1, 1024, %s1119_s11, [#allocation6], %s1029_s23, %s1029_s23, %s1030_s29  }
  0x28   : > { %s897_s17 = scalar_lea.hbm %s1326_s3, 1024 }
  0x29   : > { %p898_p2 = scmp.ne.s32.totalorder %s1326_s3, %s897_s17  ;;  %p904_p10 = scmp.lt.u32.totalorder %s897_s17, %s1326_s3 }
  0x2b   : > { %p900_p1 = pnand %p898_p2, %p871_p13 }
  0x2d   : > { %p901_p6 = pneg %p900_p1 }
  0x2f   : > { %p906_p3 = pnand %p904_p10, %p901_p6 }
  0x31   : > { %909 = shalt.err (!%p906_p3)
}
  0x32   : > { %s910_s11 = scalar_lea.vmem %s1130_s14, 1024  ;;  %p918_p12 = scmp.lt.s32.totalorder %s1130_s14, %s1130_s14 }
  0x33   : > { %p911_p5 = scmp.ne.s32.totalorder %s1130_s14, %s910_s11  ;;  %p919_p0 = scmp.lt.s32.totalorder %s910_s11, %s910_s11 }
  0x35   : > { %p913_p7 = pnand %p911_p5, %p871_p13  ;;  %p920_p2 = por %p919_p0, %p918_p12 }
  0x37   : > { %p914_p9 = pneg %p913_p7 }
  0x39   : > { %p921_p1 = pnand %p920_p2, %p914_p9 }
  0x3b   : > { %924 = shalt.err (!%p921_p1)
}
  0x3c   : > { %798 = dma.hbm_to_vmem [thread:$0]  (!%p1126_p11), %s1326_s3, 1024, %s1130_s14, [#allocation6], %s1029_s23, %s1029_s23, %s1030_s29  }
  0x3d   : > { %s1185_s13 = sadd.s32 1, %s1025_s27   ;;  %s31_s12 = sadd.s32 1, %s1021_s26 }
  0x3e   : > { %s28_s15 = ssub.s32 %s1025_s27, %s1185_s13  ;;  %p38_p13 = scmp.ne.s32.totalorder %s1021_s26, %s1017_s25 }
  0x3f   : > { %p29_p6 = scmp.eq.s32.totalorder %s28_s15, 0  ;;  %p39_p10 = scmp.eq.s32.totalorder %s1025_s27, 0 }
  0x40   : > { %p1338_p3 = scmp.eq.s32.totalorder %s1096_s28, 1  ;;  %p809_p7 = scmp.lt.s32.totalorder %s1025_s27, 2 }
  0x41   : > { %s1201_s17 = scalar_select %p29_p6, %s1021_s26, %s31_s12  }
  0x42   : > { %p1195_p5 = por %p1338_p3, %p38_p13  ;;  %p40_p9 = por %p39_p10, %p38_p13 }
  0x43   : > { %s258_s18 = sand.u32 1, %s1021_s26   ;;  %s692_s14 = sshll.u32 %s1025_s27, 7 }
  0x44   : > { %s1339_s16 = scalar_select %p1195_p5, 1, 0 }
  0x45   : > { %s691_s19 = sshll.u32 %s258_s18, 3  ;;  %s1208_s20 = scalar_lea.hbm %s1323_s0, %s692_s14 }
  0x46   : > { %s262_s21 = scalar_lea.vmem [#allocation2], %s691_s19  ;;  %p1212_p11 = pnand %p809_p7, %p40_p9 }
  0x47   : > { %s269_s11 = sshll.u32 %s262_s21, 4  ;;  %s259_s10 = scalar_lea.sflag [#allocation3], %s258_s18  ;;  %s1210_s11 = int_to_ptr.vmem [resolvable:$true] %s269_s11 }
  0x48   : > { %s925_s12 = scalar_lea.hbm %s1208_s20, 128  ;;  %p927_p0 = pneg %p1212_p11 }
  0x49   : > { %p926_p12 = scmp.ne.s32.totalorder %s1208_s20, %s925_s12  ;;  %s930_s14 = scalar_lea.hbm %s1323_s0, 256 }
  0x4a   : > { %p931_p13 = scmp.lt.u32.totalorder %s1208_s20, %s1323_s0  ;;  %p932_p6 = scmp.lt.u32.totalorder %s930_s14, %s925_s12 }
  0x4b   : > { %p928_p2 = pnand %p927_p0, %p926_p12  ;;  %p934_p3 = scmp.lt.u32.totalorder %s925_s12, %s1208_s20 }
  0x4c   : > { %p933_p10 = por %p932_p6, %p931_p13 }
  0x4d   : > { %p929_p1 = pneg %p928_p2 }
  0x4e   : > { %p935_p7 = por %p934_p3, %p933_p10 }
  0x50   : > { %p936_p9 = pnand %p935_p7, %p929_p1 }
  0x52   : > { %939 = shalt.err (!%p936_p9)
}
  0x53   : > { %s940_s18 = scalar_lea.vmem %s1210_s11, 128  ;;  %s1031_s21 = smov [#allocation2]  }
  0x54   : > { %p941_p12 = scmp.ne.s32.totalorder %s1210_s11, %s940_s18  ;;  %s945_s15 = sshll.u32 %s1031_s21, 4  ;;  %s946_s15 = int_to_ptr.vmem [resolvable:$false] %s945_s15 }
  0x55   : > { %s947_s19 = scalar_lea.vmem %s946_s15, 256  ;;  %p948_p4 = scmp.lt.s32.totalorder %s1210_s11, %s946_s15 }
  0x56   : > { %p943_p2 = pnand %p941_p12, %p927_p0  ;;  %p949_p13 = scmp.lt.s32.totalorder %s947_s19, %s940_s18 }
  0x58   : > { %p944_p5 = pneg %p943_p2  ;;  %p950_p6 = por %p949_p13, %p948_p4 }
  0x5a   : > { %p951_p10 = pnand %p950_p6, %p944_p5 }
  0x5c   : > { %954 = shalt.err (!%p951_p10)
}
  0x5d   : > { %802 = dma.hbm_to_vmem [thread:$0]  (!%p1212_p11), %s1208_s20, 128, %s1210_s11, %s259_s10  }
  0x5e   : > { %278 = sbr.rel (%p1115_p8) target bundleno = 899 (0x383), region = 48  ;;  %s1244_s12 = sand.u32 (!%p1115_p8), 1, %s1017_s25  }
  0x5f   : > { %s694_s14 = sshll.u32 (!%p1115_p8), %s1244_s12, 3  ;;  %s281_s23 = scalar_lea.sflag (!%p1115_p8), [#allocation3], %s1244_s12 }
  0x60   : > { %s1250_s29 = scalar_lea.vmem (!%p1115_p8), [#allocation2], %s694_s14  ;;  %p1341_p4 = scmp.ne.s32.totalorder (!%p1115_p8), %s1334_s30, 0 }
  0x65   : > { %1000 = dma.done.wait (%p1341_p4), %s281_s23, 128  }
  0x66   : > { %1002 = vsyncadd (%p1341_p4), %s281_s23, 4294967168  ;;  %p1342_p5 = scmp.eq.s32.totalorder %s1096_s28, 0 }
  0x68   : > { %1004 = dma.done.wait (%p1342_p5), [#allocation6], 2048   ;;  %p1343_p8 = pmov %p1342_p5 }
  0x69   : > { %v1032_v0 = vmov 0.0   ;;  %vm1033_vm0 = vmmov 0   ;;  %v851_v1 = vld [vmem:[#allocation5] sm:$0xff]   ;;  %v852_v2 = vld [vmem:[#allocation5 + $0x8] sm:$0xff]   ;;  %v853_v3 = vld [vmem:[#allocation5 + $0x10] sm:$0xff]   ;;  %v555_v34 = vlaneseq  ;;  %s719_s15 = sshll.u32 %s1096_s28, 7 }
  0x6a   : > { %1006 = vsyncadd (%p1343_p8), [#allocation6], 4294965248  ;;  %740 = vmatprep.subr.bf16.mxu0 %v1032_v0  ;;  %756 = vmatprep.mubr.msk.bf16.mxu0 %vm1033_vm0, %v1032_v0  ;;  %v859_v4 = vld [vmem:[#allocation7] sm:$0xff]   ;;  %v854_v5 = vld [vmem:[#allocation5 + $0x18] sm:$0xff]   ;;  %s322_s19 = scalar_lea.vmem [#allocation8], %s694_s14  ;;  %s1279_s9 = scalar_lea.hbm %s1330_s7, %s719_s15 }
  0x6b   : > { %760 = vmatprep.subr.bf16.mxu1 %v1032_v0  ;;  %776 = vmatprep.mubr.msk.bf16.mxu1 %vm1033_vm0, %v1032_v0  ;;  %v860_v6 = vld [vmem:[#allocation7 + $0x8] sm:$0xff]   ;;  %v855_v7 = vld [vmem:[#allocation5 + $0x20] sm:$0xff]   ;;  %v861_v8 = vld [vmem:[#allocation7 + $0x10] sm:$0xff]   ;;  %v556_v35 = vand.u32 127, %v555_v34  ;;  %s597_s23 = sshll.u32 %s322_s19, 4  ;;  %s584_s20 = scalar_lea.sflag [#allocation4], %s1244_s12  ;;  %s1281_s23 = int_to_ptr.vmem [resolvable:$true] %s597_s23 }
  0x6c   : > { %741 = vmatpush3.bf16.msra.mxu0 %v851_v1  ;;  %761 = vmatpush3.bf16.msra.mxu1 %v859_v4  ;;  %v856_v9 = vld [vmem:[#allocation5 + $0x28] sm:$0xff]   ;;  %v862_v10 = vld [vmem:[#allocation7 + $0x18] sm:$0xff]   ;;  %v857_v11 = vld [vmem:[#allocation5 + $0x30] sm:$0xff]   ;;  %s955_s11 = scalar_lea.vmem %s1281_s23, 128  ;;  %p1344_p0 = scmp.ne.s32.totalorder %s1339_s16, 0 }
  0x6d   : > { %742 = vmatprep.subr.bf16.mxu0 %v1032_v0  ;;  %762 = vmatprep.subr.bf16.mxu1 %v1032_v0  ;;  %v863_v12 = vld [vmem:[#allocation7 + $0x20] sm:$0xff]   ;;  %v858_v13 = vld [vmem:[#allocation5 + $0x38] sm:$0xff]   ;;  %v864_v15 = vld [vmem:[#allocation7 + $0x28] sm:$0xff]   ;;  %vm557_vm1 = vcmp.lt.s32.totalorder %v556_v35, 32  ;;  %p956_p11 = scmp.ne.s32.totalorder %s1281_s23, %s955_s11  ;;  %s1034_s28 = smov [#allocation8]  }
  0x6e   : > { %v324_v14 = vld [vmem:[%s1250_s29] sm:$0xff]  ;;  %s959_s14 = sshll.u32 %s1034_s28, 4  ;;  %s960_s14 = int_to_ptr.vmem [resolvable:$false] %s959_s14 }
  0x6f   : > { %v325_v16 = vpack.c.bf16 %v324_v14, %v324_v14  ;;  %v865_v17 = vld [vmem:[#allocation7 + $0x30] sm:$0xff]   ;;  %v866_v18 = vld [vmem:[#allocation7 + $0x38] sm:$0xff]   ;;  %p957_p1 = pnand %p956_p11, %p1344_p0  ;;  %s961_s22 = scalar_lea.vmem %s960_s14, 256 }
  0x70   : > { %743 = vmatpush3.bf16.msra.mxu0 %v852_v2  ;;  %763 = vmatpush3.bf16.msra.mxu1 %v860_v6  ;;  %v698_v19 = vld [vmem:[%s1325_s2] ss:$0 sm:$0xff]  ;;  %p962_p7 = scmp.lt.s32.totalorder %s1281_s23, %s960_s14  ;;  %p963_p9 = scmp.lt.s32.totalorder %s961_s22, %s955_s11 }
  0x71   : > { %744 = vmatprep.subr.bf16.mxu0 %v1032_v0  ;;  %764 = vmatprep.subr.bf16.mxu1 %v1032_v0  ;;  %v707_v27 = vld [vmem:[%s1327_s4] ss:$0 sm:$0xff]  ;;  %p958_p3 = pneg %p957_p1 }
  0x72   : > { %v716_v45 = vld [vmem:[%s1328_s5] ss:$0 sm:$0xff]  ;;  %p964_p12 = por %p963_p9, %p962_p7 }
  0x73   : > { %v717_v47 = vld [vmem:[%s1329_s6] ss:$0 sm:$0xff] }
  0x74   : > { %745 = vmatpush3.bf16.msra.mxu0 %v853_v3  ;;  %765 = vmatpush3.bf16.msra.mxu1 %v861_v8  ;;  %p965_p2 = pnand %p964_p12, %p958_p3 }
  0x75   : > { %746 = vmatprep.subr.bf16.mxu0 %v1032_v0  ;;  %766 = vmatprep.subr.bf16.mxu1 %v1032_v0 }
  0x78   : > { %747 = vmatpush3.bf16.msra.mxu0 %v854_v5  ;;  %767 = vmatpush3.bf16.msra.mxu1 %v862_v10 }
  0x79   : > { %748 = vmatprep.subr.bf16.mxu0 %v1032_v0  ;;  %768 = vmatprep.subr.bf16.mxu1 %v1032_v0 }
  0x7c   : > { %749 = vmatpush3.bf16.msra.mxu0 %v855_v7  ;;  %769 = vmatpush3.bf16.msra.mxu1 %v863_v12 }
  0x7d   : > { %750 = vmatprep.subr.bf16.mxu0 %v1032_v0  ;;  %770 = vmatprep.subr.bf16.mxu1 %v1032_v0 }
  0x80   : > { %751 = vmatpush3.bf16.msra.mxu0 %v856_v9  ;;  %771 = vmatpush3.bf16.msra.mxu1 %v864_v15 }
  0x81   : > { %752 = vmatprep.subr.bf16.mxu0 %v1032_v0  ;;  %772 = vmatprep.subr.bf16.mxu1 %v1032_v0 }
  0x84   : > { %753 = vmatpush3.bf16.msra.mxu0 %v857_v11  ;;  %773 = vmatpush3.bf16.msra.mxu1 %v865_v17 }
  0x85   : > { %754 = vmatprep.subr.bf16.mxu0 %v1032_v0  ;;  %774 = vmatprep.subr.bf16.mxu1 %v1032_v0 }
  0x88   : > { %755 = vmatpush3.bf16.msra.mxu0 %v858_v13  ;;  %775 = vmatpush3.bf16.msra.mxu1 %v866_v18 }
  0x8b   : > { %757 = vmatmul.mubr.bf16.vlgmr.msra.gmra.mrb[0].mxu0 %v325_v16 }
 0x15e   : > { %v431_v20 = vpop.f32.mrb[0].mxu0 }
 0x15f   : > { %v432_v21 = vadd.f32 %v698_v19, %v431_v20  ;;  %v758_v22 = vpop.f32.mrb[1].mxu0 }
 0x160   : > { %v434_v23 = vpop.f32.mrb[2].mxu0 }
 0x161   : > { %v437_v24 = vmax.f32 %v432_v21, 0.0  ;;  %v759_v25 = vpop.f32.mrb[3].mxu0 }
 0x163   : > { %v438_v26 = vpack.c.bf16 %v437_v24, %v437_v24 }
 0x165   : > { %777 = vmatmul.mubr.bf16.vlgmr.msra.gmra.mrb[0].mxu1 %v438_v26 }
 0x238   : > { %v544_v28 = vpop.f32.mrb[0].mxu1 }
 0x239   : > { %v545_v29 = vadd.f32 %v707_v27, %v544_v28  ;;  %v778_v30 = vpop.f32.mrb[1].mxu1 }
 0x23a   : > { %v547_v31 = vpop.f32.mrb[2].mxu1 }
 0x23b   : > { %v779_v32 = vpop.f32.mrb[3].mxu1  ;;  %v550_v33 = vadd.f32 %v545_v29, %v324_v14 }
 0x23d   : > { %551 = vadd.xlane.f32.xlu0 %v550_v33 }
 0x2ca   : > { %v552_v36 = vpop.xlane.xlu0 %551 }
 0x2cb   : > { %v553_v37 = vmul.f32 0.03125, %v552_v36 }
 0x2cd   : > { %v554_v38 = vsub.f32 %v550_v33, %v553_v37 }
 0x2cf   : > { %v558_v39 = vsel %vm557_vm1, %v554_v38, 0.0 }
 0x2d0   : > { %v559_v40 = vmul.f32 %v558_v39, %v558_v39 }
 0x2d2   : > { %560 = vadd.xlane.f32.xlu0 %v559_v40 }
 0x35f   : > { %v561_v41 = vpop.xlane.xlu0 %560 }
 0x360   : > { %v562_v42 = vmul.f32 0.03125, %v561_v41 }
 0x362   : > { %v563_v43 = vadd.f32 1e-06, %v562_v42 }
 0x364   : > { %867 = vrsqrt.f32 %v563_v43 }
 0x36e   : > { %v868_v44 = vpop.eup %867 }
 0x36f   : > { %v565_v46 = vmul.f32 %v868_v44, %v558_v39 }
 0x371   : > { %v573_v48 = vmul.f32 %v716_v45, %v565_v46 }
 0x373   : > { %v581_v49 = vadd.f32 %v717_v47, %v573_v48 }
 0x375   : > { %582 = vst [vmem:[%s322_s19] sm:$0xff] %v581_v49 }
 0x376   : > { %968 = shalt.err (!%p965_p2)
}
 0x377   : > { %s969_s12 = scalar_lea.hbm %s1279_s9, 128  ;;  %s973_s21 = scalar_lea.hbm %s1330_s7, 256 }
 0x378   : > { %p970_p13 = scmp.ne.s32.totalorder %s1279_s9, %s969_s12  ;;  %p974_p4 = scmp.lt.u32.totalorder %s1279_s9, %s1330_s7 }
 0x379   : > { %p975_p5 = scmp.lt.u32.totalorder %s973_s21, %s969_s12  ;;  %p977_p11 = scmp.lt.u32.totalorder %s969_s12, %s1279_s9 }
 0x37a   : > { %p971_p6 = pnand %p970_p13, %p1344_p0 }
 0x37b   : > { %p976_p8 = por %p975_p5, %p974_p4 }
 0x37c   : > { %p972_p10 = pneg %p971_p6 }
 0x37d   : > { %p978_p1 = por %p977_p11, %p976_p8 }
 0x37f   : > { %p979_p3 = pnand %p978_p1, %p972_p10 }
 0x381   : > { %982 = shalt.err (!%p979_p3)
}
 0x382   : > { %790 = dma.vmem_to_hbm [thread:$0]  (%p1344_p0), %s1281_s23, 128, %s1279_s9, %s584_s20  }
 0x383 PF: > { %s609_s29 = sand.u32 1, %s1013_s24   ;;  %p1345_p7 = scmp.ne.s32.totalorder %s1335_s8, 0 }
 0x384   : > { %p1346_p9 = scmp.ge.s32.totalorder %s1025_s27, 2  ;;  %s610_s30 = scalar_lea.sflag [#allocation4], %s609_s29 }
 0x386   : > { %p804_p12 = pnand %p1346_p9, %p1345_p7 }
 0x388   : > { %1008 = dma.done.wait (!%p804_p12), %s610_s30, 128  }
 0x389   : > { %1010 = vsyncadd (!%p804_p12), %s610_s30, 4294967168  ;;  %p21_p2 = scmp.ge.s32.totalorder %s1185_s13, 4   ;;  %s1347_s24 = smov %s1017_s25 }
 0x38a   : > { %s1348_s25 = smov %s1021_s26  ;;  %s1349_s26 = smov %s1201_s17 }
 0x38b   : > { %s1350_s27 = smov %s1185_s13  ;;  %23 = sbr.rel (!%p21_p2) target bundleno = 6 (0x6), region = 101 }
 0x392   :  { %615 = vsyncpa [#allocation3], 1 }
 0x393   :  { %617 = vsyncpa [#allocation3 + $0x1], 1 }
 0x394   :  { %618 = vsyncpa [#allocation6], 1 }
 0x395   :  { %619 = vsyncpa [#allocation4], 1 }
 0x396   :  { %621 = vsyncpa [#allocation4 + $0x1], 1 }

</bundles_post_ra>
